<compile_context>
chip_gen: v7x
topology: tpu7x:2x2x1
jax: 0.10.0
libtpu: 0.0.40
codegen_flags: <defaults>
</compile_context>

<pallas_src>
import jax
import jax.numpy as jnp
from jax.experimental import pallas as pl
from jax.experimental.pallas import tpu as pltpu

# ---- model hyper-parameters (match the PyTorch module defaults) -------------
VOCAB = 50
EMBED_DIM = 32          # `embedding` passed as int -> embedding_dim = d_m
KERNEL_SIZES = (3, 4, 5)
FILTER_NUM = 16
PAD_IDX = 0             # vocab.vocab['<pad>']

B = 2                   # batch
L = 16                  # sequence length

NUM_TAPS = sum(KERNEL_SIZES)                      # 12
N_FEAT = FILTER_NUM * len(KERNEL_SIZES)           # 48
VOCAB_PAD = ((VOCAB + 7) // 8) * 8                # 56: sublane-aligned table rows
C_PAD = 256                                       # 192 tap cols -> 2 full lane tiles


def textcnn_kernel(tok_ref, table_ref, convb_ref, lw_ref, lb_ref, o_ref):
    """tok_ref: (TB*L, 1) i32 tokens.  table_ref: (V_PAD, C_PAD) f32 fused
    embedding@tap table.  convb_ref / lw_ref: (1, 3F) f32.  lb_ref: (1, 1) f32
    in SMEM.  o_ref: (1, TB) f32 lane-dense sigmoid output."""
    TBL = tok_ref.shape[0]
    TB = o_ref.shape[1]
    Lk = TBL // TB
    Vp = table_ref.shape[0]
    Cp = table_ref.shape[1]
    F = FILTER_NUM

    # Fused embedding-gather + all-conv-tap matmul: ONE MXU op.
    # one_hot (TBL, Vp) @ fused_table (Vp, Cp) selects exact f32 table rows.
    tok = tok_ref[...]                                              # (TBL, 1) i32
    one_hot = (jax.lax.broadcasted_iota(jnp.int32, (TBL, Vp), 1) == tok
               ).astype(jnp.float32)                                # (TBL, Vp)
    y = jnp.dot(one_hot, table_ref[...],
                preferred_element_type=jnp.float32)                 # (TBL, Cp)
    y = y.reshape(TB, Lk, Cp)   # leading-dim split only; Lk (=16) is a multiple
                                # of 8, so the minor (sublane, lane) tiling is
                                # unchanged (no VMEM relayout).

    # Tap combination (statically shifted VPU adds) + max-over-time (XLU).
    # TODO(synk): at production TB these 16-lane tap slices become the binding
    # data-movement cost; restructure (time-on-lanes + pltpu.roll, or per-k
    # im2col MXU matmuls) if this kernel is ever run at large batch.
    col = 0
    pooled = []
    for k in KERNEL_SIZES:
        l_out = Lk - k + 1
        acc = y[:, 0:l_out, col:col + F]
        col += F
        for r in range(1, k):
            acc = acc + y[:, r:r + l_out, col:col + F]
            col += F
        pooled.append(jnp.max(acc, axis=1))                         # (TB, F)
    feat = jnp.concatenate(pooled, axis=1)                          # (TB, 3F)

    # Conv bias + ReLU commute with max-over-time (both monotone): apply once.
    feat = jnp.maximum(feat + convb_ref[...], 0.0)

    # TODO(synk): nn.Dropout(0.2) is inference-mode identity (no RNG mask).

    # Final 48 -> 1 linear contracted so the batch lands on the LANE axis of
    # the output: (1,48) x (TB,48)^T -> (1,TB) (unmasked lane-dense store).
    logit = jnp.einsum("of,bf->ob", lw_ref[...], feat,
                       preferred_element_type=jnp.float32) + lb_ref[0, 0]
    o_ref[...] = jax.nn.sigmoid(logit)


def init_params(key):
    keys = jax.random.split(key, 2 * len(KERNEL_SIZES) + 3)
    params = {}
    emb = 0.1 * jax.random.normal(keys[0], (VOCAB, EMBED_DIM), jnp.float32)
    emb = emb.at[PAD_IDX].set(0.0)                  # padding_idx row is zero
    params["embedding"] = emb
    for i, k in enumerate(KERNEL_SIZES):
        params[f"conv{k}_w"] = 0.1 * jax.random.normal(
            keys[1 + 2 * i], (k * EMBED_DIM, FILTER_NUM), jnp.float32)
        params[f"conv{k}_b"] = 0.1 * jax.random.normal(
            keys[2 + 2 * i], (1, FILTER_NUM), jnp.float32)
    params["lin_w"] = 0.1 * jax.random.normal(keys[-2], (1, N_FEAT), jnp.float32)
    params["lin_b"] = 0.1 * jax.random.normal(keys[-1], (1, 1), jnp.float32)
    return params


def pack_tap_weights(params):
    """(k*D, F) conv weights -> one (D, sum(k)*F) tap matrix.

    Column order: [k=3 taps 0..2 | k=4 taps 0..3 | k=5 taps 0..4], each F wide.
    """
    cols = []
    for k in KERNEL_SIZES:
        wk = params[f"conv{k}_w"]                          # (k*D, F)
        for r in range(k):
            cols.append(wk[r * EMBED_DIM:(r + 1) * EMBED_DIM, :])   # (D, F)
    return jnp.concatenate(cols, axis=1)                   # (D, 12*F)


def prepare_params(params):
    """One-time (per param load) packing — hoisted out of the per-call path.

    fused_table[v, :] = embedding[v] @ [tap_0 | ... | tap_11], zero-padded to
    (VOCAB_PAD, C_PAD) so the kernel's gather-matmul output fills two full
    128-lane tiles.  The <pad> embedding row is zero, so fused_table[PAD_IDX]=0.
    """
    w_taps = pack_tap_weights(params)                       # (D, 12F) f32
    fused = params["embedding"] @ w_taps                    # (VOCAB, 12F) f32
    table = jnp.zeros((VOCAB_PAD, C_PAD), jnp.float32)
    table = table.at[:VOCAB, :NUM_TAPS * FILTER_NUM].set(fused)
    conv_b = jnp.concatenate(
        [params[f"conv{k}_b"] for k in KERNEL_SIZES], axis=1)        # (1, 3F)
    return {"table": table, "conv_b": conv_b,
            "lin_w": params["lin_w"], "lin_b": params["lin_b"]}


def _choose_batch_tile(batch):
    # One tile for small batches; lane-aligned (multiple-of-128) tiles for big
    # batches so the (1, TB) output block is unmasked and >=2 grid steps shard
    # across v7x's two TensorCores.  TB=128 -> M = TB*L = 2048 (multiple of 256
    # for the v6e/v7x MXU, of 128 for v5e) with ~3 MiB of live f32
    # intermediates, well inside the 16/32 MiB scoped-VMEM defaults.
    if batch <= 128:
        return batch
    return 128


def textcnn_forward(tokens, prepped):
    Bn, Ln = tokens.shape
    TB = _choose_batch_tile(Bn)
    Bp = ((Bn + TB - 1) // TB) * TB
    if Bp != Bn:
        # Pad with <pad> tokens: the pad table row is zero, so padded rows give
        # finite (sliced-away) outputs — no NaNs in masked lanes.
        tokens = jnp.pad(tokens, ((0, Bp - Bn), (0, 0)),
                         constant_values=PAD_IDX)
    tok_flat = tokens.astype(jnp.int32).reshape(Bp * Ln, 1)

    out = pl.pallas_call(
        textcnn_kernel,
        out_shape=jax.ShapeDtypeStruct((1, Bp), jnp.float32),
        grid_spec=pltpu.PrefetchScalarGridSpec(
            num_scalar_prefetch=0,
            grid=(Bp // TB,),
            in_specs=[
                pl.BlockSpec((TB * Ln, 1), lambda i: (i, 0)),          # tokens
                pl.BlockSpec((VOCAB_PAD, C_PAD), lambda i: (0, 0)),    # fused table
                pl.BlockSpec((1, N_FEAT), lambda i: (0, 0)),           # conv bias
                pl.BlockSpec((1, N_FEAT), lambda i: (0, 0)),           # linear w
                pl.BlockSpec((1, 1), lambda i: (0, 0),
                             memory_space=pltpu.MemorySpace.SMEM),     # linear b
            ],
            out_specs=pl.BlockSpec((1, TB), lambda i: (0, i)),
        ),
        compiler_params=pltpu.CompilerParams(
            dimension_semantics=("parallel",)),
    )(tok_flat, prepped["table"], prepped["conv_b"],
      prepped["lin_w"], prepped["lin_b"])

    return out[:, :Bn].reshape(Bn, 1)


def textcnn_reference(tokens, params):
    """Pure-JAX f32 reference (original window-matmul formulation)."""
    x = jnp.take(params["embedding"], tokens, axis=0)                # (B, L, D)
    L_seq = tokens.shape[1]
    feats = []
    for k in KERNEL_SIZES:
        l_out = L_seq - k + 1
        windows = jnp.concatenate([x[:, r:r + l_out, :] for r in range(k)],
                                  axis=-1)                           # (B, l_out, k*D)
        conv = jnp.einsum("blk,kf->blf", windows, params[f"conv{k}_w"],
                          preferred_element_type=jnp.float32) \
            + params[f"conv{k}_b"][None]
        conv = jnp.maximum(conv, 0.0)
        feats.append(jnp.max(conv, axis=1))                          # (B, F)
    feat = jnp.concatenate(feats, axis=1)                            # (B, 3F)
    return jax.nn.sigmoid(feat @ params["lin_w"].T + params["lin_b"])


if __name__ == "__main__":
    key = jax.random.PRNGKey(0)
    pkey, tkey = jax.random.split(key)
    params = init_params(pkey)
    prepped = prepare_params(params)        # one-time weight packing (hoisted)
    tokens = jax.random.randint(tkey, (B, L), 0, VOCAB, dtype=jnp.int32)

    fwd = jax.jit(lambda t: textcnn_forward(t, prepped))
    out = jax.block_until_ready(fwd(tokens))
    assert out.shape == (B, 1)

    # Everything is f32 end-to-end (the one-hot gather-matmul is exact), so the
    # kernel matches the f32 reference up to accumulation order / exp impl.
    ref = textcnn_reference(tokens, params)
    assert jnp.allclose(out, ref, atol=1e-4, rtol=1e-4), (out, ref)

    print("KERNEL_OK")
</pallas_src>

<mosaic_0001>
module attributes {stable_mosaic.version = 11 : i64} {
  func.func @textcnn_kernel(%arg0: i32, %arg1: memref<32x1xi32, #tpu.memory_space<vmem>>, %arg2: memref<56x256xf32, #tpu.memory_space<vmem>>, %arg3: memref<1x48xf32, #tpu.memory_space<vmem>>, %arg4: memref<1x48xf32, #tpu.memory_space<vmem>>, %arg5: memref<1x1xf32, #tpu.memory_space<smem>>, %arg6: memref<1x2xf32, #tpu.memory_space<vmem>>) attributes {dimension_semantics = [#tpu.dimension_semantics<parallel>], iteration_bounds = array<i64: 1>, scalar_prefetch = 0 : i64, scratch_operands = 0 : i64, tpu.core_type = #tpu.core_type<tc>, window_params = [{transform_indices = @transform_0, window_bounds = array<i64: 32, 1>}, {pipeline_mode = #tpu.pipeline_mode<synchronous>, transform_indices = @transform_1, window_bounds = array<i64: 56, 256>}, {pipeline_mode = #tpu.pipeline_mode<synchronous>, transform_indices = @transform_2, window_bounds = array<i64: 1, 48>}, {pipeline_mode = #tpu.pipeline_mode<synchronous>, transform_indices = @transform_3, window_bounds = array<i64: 1, 48>}, {transform_indices = @transform_4, window_bounds = array<i64: 1, 1>}, {transform_indices = @transform_5, window_bounds = array<i64: 1, 2>}]} {
    %c0 = arith.constant 0 : index
    %c0_0 = arith.constant 0 : index
    %0 = vector.load %arg1[%c0, %c0_0] : memref<32x1xi32, #tpu.memory_space<vmem>>, vector<32x1xi32>
    %1 = tpu.iota {dimensions = array<i32: 1>} : vector<32x56xi32>
    %2 = vector.broadcast %0 : vector<32x1xi32> to vector<32x56xi32>
    %3 = arith.cmpi eq, %1, %2 : vector<32x56xi32>
    %4 = arith.extui %3 : vector<32x56xi1> to vector<32x56xi32>
    %5 = arith.sitofp %4 : vector<32x56xi32> to vector<32x56xf32>
    %c0_1 = arith.constant 0 : index
    %c0_2 = arith.constant 0 : index
    %6 = vector.load %arg2[%c0_1, %c0_2] : memref<56x256xf32, #tpu.memory_space<vmem>>, vector<56x256xf32>
    %cst = arith.constant dense<0.000000e+00> : vector<32x256xf32>
    %7 = tpu.matmul %5, %6, %cst {dimension_numbers = #tpu.dot_dimension_numbers<[1], [0], [0], [1], [0, 0, 1, 1], [], []>} : vector<32x56xf32>, vector<56x256xf32>, vector<32x256xf32> -> vector<32x256xf32>
    %8 = vector.shape_cast %7 : vector<32x256xf32> to vector<2x16x256xf32>
    %9 = vector.extract_strided_slice %8 {offsets = [0, 0, 0], sizes = [2, 14, 16], strides = [1, 1, 1]} : vector<2x16x256xf32> to vector<2x14x16xf32>
    %10 = vector.extract_strided_slice %8 {offsets = [0, 1, 16], sizes = [2, 14, 16], strides = [1, 1, 1]} : vector<2x16x256xf32> to vector<2x14x16xf32>
    %11 = arith.addf %9, %10 : vector<2x14x16xf32>
    %12 = vector.extract_strided_slice %8 {offsets = [0, 2, 32], sizes = [2, 14, 16], strides = [1, 1, 1]} : vector<2x16x256xf32> to vector<2x14x16xf32>
    %13 = arith.addf %11, %12 : vector<2x14x16xf32>
    %cst_3 = arith.constant dense<0xFF800000> : vector<2x16xf32>
    %14 = vector.multi_reduction <maximumf>, %13, %cst_3 [1] : vector<2x14x16xf32> to vector<2x16xf32>
    %15 = vector.extract_strided_slice %8 {offsets = [0, 0, 48], sizes = [2, 13, 16], strides = [1, 1, 1]} : vector<2x16x256xf32> to vector<2x13x16xf32>
    %16 = vector.extract_strided_slice %8 {offsets = [0, 1, 64], sizes = [2, 13, 16], strides = [1, 1, 1]} : vector<2x16x256xf32> to vector<2x13x16xf32>
    %17 = arith.addf %15, %16 : vector<2x13x16xf32>
    %18 = vector.extract_strided_slice %8 {offsets = [0, 2, 80], sizes = [2, 13, 16], strides = [1, 1, 1]} : vector<2x16x256xf32> to vector<2x13x16xf32>
    %19 = arith.addf %17, %18 : vector<2x13x16xf32>
    %20 = vector.extract_strided_slice %8 {offsets = [0, 3, 96], sizes = [2, 13, 16], strides = [1, 1, 1]} : vector<2x16x256xf32> to vector<2x13x16xf32>
    %21 = arith.addf %19, %20 : vector<2x13x16xf32>
    %cst_4 = arith.constant dense<0xFF800000> : vector<2x16xf32>
    %22 = vector.multi_reduction <maximumf>, %21, %cst_4 [1] : vector<2x13x16xf32> to vector<2x16xf32>
    %23 = vector.extract_strided_slice %8 {offsets = [0, 0, 112], sizes = [2, 12, 16], strides = [1, 1, 1]} : vector<2x16x256xf32> to vector<2x12x16xf32>
    %24 = vector.extract_strided_slice %8 {offsets = [0, 1, 128], sizes = [2, 12, 16], strides = [1, 1, 1]} : vector<2x16x256xf32> to vector<2x12x16xf32>
    %25 = arith.addf %23, %24 : vector<2x12x16xf32>
    %26 = vector.extract_strided_slice %8 {offsets = [0, 2, 144], sizes = [2, 12, 16], strides = [1, 1, 1]} : vector<2x16x256xf32> to vector<2x12x16xf32>
    %27 = arith.addf %25, %26 : vector<2x12x16xf32>
    %28 = vector.extract_strided_slice %8 {offsets = [0, 3, 160], sizes = [2, 12, 16], strides = [1, 1, 1]} : vector<2x16x256xf32> to vector<2x12x16xf32>
    %29 = arith.addf %27, %28 : vector<2x12x16xf32>
    %30 = vector.extract_strided_slice %8 {offsets = [0, 4, 176], sizes = [2, 12, 16], strides = [1, 1, 1]} : vector<2x16x256xf32> to vector<2x12x16xf32>
    %31 = arith.addf %29, %30 : vector<2x12x16xf32>
    %cst_5 = arith.constant dense<0xFF800000> : vector<2x16xf32>
    %32 = vector.multi_reduction <maximumf>, %31, %cst_5 [1] : vector<2x12x16xf32> to vector<2x16xf32>
    %33 = tpu.concatenate %14, %22, %32 in 1 : vector<2x16xf32>, vector<2x16xf32>, vector<2x16xf32> -> vector<2x48xf32>
    %c0_6 = arith.constant 0 : index
    %c0_7 = arith.constant 0 : index
    %34 = vector.load %arg3[%c0_6, %c0_7] : memref<1x48xf32, #tpu.memory_space<vmem>>, vector<1x48xf32>
    %35 = vector.broadcast %34 : vector<1x48xf32> to vector<2x48xf32>
    %36 = arith.addf %33, %35 : vector<2x48xf32>
    %cst_8 = arith.constant 0.000000e+00 : f32
    %37 = vector.broadcast %cst_8 : f32 to vector<2x48xf32>
    %38 = arith.maximumf %36, %37 : vector<2x48xf32>
    %c0_9 = arith.constant 0 : index
    %c0_10 = arith.constant 0 : index
    %39 = vector.load %arg4[%c0_9, %c0_10] : memref<1x48xf32, #tpu.memory_space<vmem>>, vector<1x48xf32>
    "tpu.trace_start"() <{level = 10 : i32, message = "of,bf->ob"}> : () -> ()
    %cst_11 = arith.constant dense<0.000000e+00> : vector<1x2xf32>
    %40 = tpu.matmul %39, %38, %cst_11 {dimension_numbers = #tpu.dot_dimension_numbers<[1], [1], [0], [0], [0, 0, 1, 0], [], []>} : vector<1x48xf32>, vector<2x48xf32>, vector<1x2xf32> -> vector<1x2xf32>
    "tpu.trace_stop"() : () -> ()
    %c0_12 = arith.constant 0 : index
    %c0_13 = arith.constant 0 : index
    %41 = memref.load %arg5[%c0_12, %c0_13] : memref<1x1xf32, #tpu.memory_space<smem>>
    %42 = vector.broadcast %41 : f32 to vector<1x2xf32>
    %43 = arith.addf %40, %42 : vector<1x2xf32>
    %44 = arith.negf %43 : vector<1x2xf32>
    %45 = math.exp %44 : vector<1x2xf32>
    %cst_14 = arith.constant 1.000000e+00 : f32
    %46 = vector.broadcast %cst_14 : f32 to vector<1x2xf32>
    %47 = arith.addf %46, %45 : vector<1x2xf32>
    %48 = arith.divf %46, %47 : vector<1x2xf32>
    %c0_15 = arith.constant 0 : index
    %c0_16 = arith.constant 0 : index
    %49 = vector.load %arg6[%c0_15, %c0_16] : memref<1x2xf32, #tpu.memory_space<vmem>>, vector<1x2xf32>
    tpu.vector_store %arg6[%c0_15, %c0_16], %48 {strides = array<i32>} : memref<1x2xf32, #tpu.memory_space<vmem>>, vector<1x2xf32>,
    return
  }
  func.func @transform_0(%arg0: i32) -> (i32, i32) {
    %c0_i32 = arith.constant 0 : i32
    %c0_i32_0 = arith.constant 0 : i32
    return %arg0, %c0_i32 : i32, i32
  }
  func.func @transform_1(%arg0: i32) -> (i32, i32) {
    %c0_i32 = arith.constant 0 : i32
    %c0_i32_0 = arith.constant 0 : i32
    %c0_i32_1 = arith.constant 0 : i32
    return %c0_i32, %c0_i32_0 : i32, i32
  }
  func.func @transform_2(%arg0: i32) -> (i32, i32) {
    %c0_i32 = arith.constant 0 : i32
    %c0_i32_0 = arith.constant 0 : i32
    %c0_i32_1 = arith.constant 0 : i32
    return %c0_i32, %c0_i32_0 : i32, i32
  }
  func.func @transform_3(%arg0: i32) -> (i32, i32) {
    %c0_i32 = arith.constant 0 : i32
    %c0_i32_0 = arith.constant 0 : i32
    %c0_i32_1 = arith.constant 0 : i32
    return %c0_i32, %c0_i32_0 : i32, i32
  }
  func.func @transform_4(%arg0: i32) -> (i32, i32) {
    %c0_i32 = arith.constant 0 : i32
    %c0_i32_0 = arith.constant 0 : i32
    %c0_i32_1 = arith.constant 0 : i32
    return %c0_i32, %c0_i32_0 : i32, i32
  }
  func.func @transform_5(%arg0: i32) -> (i32, i32) {
    %c0_i32 = arith.constant 0 : i32
    %c0_i32_0 = arith.constant 0 : i32
    return %c0_i32, %arg0 : i32, i32
  }
}

</mosaic_0001>

<bundles_post_ra>
// kernel: _lambda_.1
= control target key start
LH: loop header
LB: loop body
LE: loop exit
PB: predicated region body
PF: predicated region fallthrough
CT: control target
= control target key end

     0   :  { %11 = vsyncpa [#allocation4], 0  ;;  %s842_s0 = inlined_call_operand.vmem [shape: s32[32,1], index: 0, kind: input, shape index: {}]   ;;  %s843_s1 = inlined_call_operand.hbm [shape: f32[56,256], index: 1, kind: input, shape index: {}]   ;;  %s844_s2 = inlined_call_operand.vmem [shape: f32[1,48], index: 2, kind: input, shape index: {}]   ;;  %s845_s3 = inlined_call_operand.vmem [shape: f32[1,48], index: 3, kind: input, shape index: {}]   ;;  %s846_s4 = inlined_call_operand.<no memory space> [shape: f32[1,1], index: 4, kind: input, shape index: {}]   ;;  %s847_s5 = inlined_call_operand.hbm [shape: f32[1,2], index: 5, kind: output, shape index: {}]  }
   0x1   :  { %12 = vsyncpa [#allocation5], 0  ;;  %s645_s18 = smov [#allocation3]   ;;  %s597_s22 = scalar_lea.hbm %s843_s1, 1792 }
   0x2   :  { %s20_s19 = sshll.u32 %s645_s18, 4  ;;  %p598_p0 = scmp.ne.s32.totalorder %s843_s1, %s597_s22  ;;  %s21_s19 = int_to_ptr.vmem [resolvable:$true] %s20_s19 }
   0x3   :  { %p601_p1 = scmp.lt.u32.totalorder %s597_s22, %s843_s1 }
   0x5   :  { %p603_p2 = pnand %p601_p1, %p598_p0 }
   0x7   :  { %606 = shalt.err (!%p603_p2)
}
   0x8   :  { %s607_s27 = scalar_lea.vmem %s21_s19, 1792  ;;  %p612_p4 = scmp.lt.s32.totalorder %s21_s19, %s21_s19 }
   0x9   :  { %p608_p3 = scmp.ne.s32.totalorder %s21_s19, %s607_s27  ;;  %p613_p5 = scmp.lt.s32.totalorder %s607_s27, %s607_s27 }
   0xb   :  { %p614_p6 = por %p613_p5, %p612_p4 }
   0xd   :  { %p615_p7 = pnand %p614_p6, %p608_p3 }
   0xf   :  { %618 = shalt.err (!%p615_p7)
}
  0x10   :  { %s646_s28 = smov 256   ;;  %s647_s29 = smov 16  }
  0x11   :  { %26 = dma.hbm_to_vmem [thread:$0]  %s843_s1, 1792, %s21_s19, [#allocation4], %s646_s28, %s646_s28, %s647_s29  }
  0x12   :  { %641 = dma.done.wait [#allocation4], 1792  }
  0x13   :  { %642 = vsyncadd [#allocation4], 4294965504  ;;  %v648_v0 = vmov 0   ;;  %v649_v1 = vmov 0.0   ;;  %v38_v2 = vld [vmem:[%s842_s0 + $0x10] sm:$0xff]  ;;  %v36_v3 = vld [vmem:[%s842_s0] sm:$0xff]  ;;  %v40_v26 = vlaneseq }
  0x14   :  { %592 = vset.pattern.permute.xlu1 %v648_v0  ;;  %591 = vset.pattern.permute.xlu0 %v648_v0  ;;  %v39_v4 = vld [vmem:[%s842_s0 + $0x18] sm:$0xff]  ;;  %v37_v5 = vld [vmem:[%s842_s0 + $0x8] sm:$0xff]  ;;  %v66_v9 = vld [vmem:[#allocation3] sm:$0xff]  ;;  %vm80_vm0 = vcmask 457728   ;;  %vm186_vm5 = vcmask 1046528   ;;  %vm209_vm6 = vcmask 1045504  }
  0x15   :  { %157 = vmatprep.mubr.f32.mxu0 %v649_v1  ;;  %175 = vmatprep.mubr.f32.mxu1 %v649_v1  ;;  %v67_v6 = vld [vmem:[#allocation3 + $0x8] sm:$0xff]  ;;  %v69_v7 = vld [vmem:[#allocation3 + $0x18] sm:$0xff]  ;;  %v68_v10 = vld [vmem:[#allocation3 + $0x10] sm:$0xff]  ;;  %v41_v27 = vand.u32 127, %v40_v26  ;;  %vm252_vm7 = vcmask 1044480   ;;  %vm365_vm8 = vcmask 1043456  }
  0x16   :  { %49 = vperm.xlu1 %592, %v38_v2   ;;  %43 = vperm.xlu0 %591, %v36_v3   ;;  %v559_v8 = vpack.c.bf16 %v69_v7, %v67_v6  ;;  %v71_v11 = vld [vmem:[#allocation3 + $0x28] sm:$0xff]  ;;  %v561_v12 = vpack.c.bf16 %v68_v10, %v66_v9  ;;  %v73_v13 = vld [vmem:[#allocation3 + $0x38] sm:$0xff]  ;;  %v70_v14 = vld [vmem:[#allocation3 + $0x20] sm:$0xff]  ;;  %s650_s0 = smov 112   ;;  %s651_s14 = smov 96   ;;  %vm232_vm9 = vcmask 130048  }
  0x17   :  { %v72_v15 = vld [vmem:[#allocation3 + $0x30] sm:$0xff]  ;;  %v563_v16 = vpack.c.bf16 %v73_v13, %v71_v11  ;;  %v75_v17 = vld [vmem:[#allocation3 + $0x48] sm:$0xff]  ;;  %v77_v18 = vld [vmem:[#allocation3 + $0x58] sm:$0xff]  ;;  %s652_s15 = smov 80   ;;  %s653_s16 = smov 64   ;;  %vm234_vm10 = vcmask 128000  }
  0x18   :  { %560 = vmatprep.subr.bf16.mxu0 %v559_v8  ;;  %571 = vmatprep.subr.bf16.mxu1 %v559_v8  ;;  %v565_v19 = vpack.c.bf16 %v72_v15, %v70_v14  ;;  %v567_v20 = vpack.c.bf16 %v77_v18, %v75_v17  ;;  %v74_v21 = vld [vmem:[#allocation3 + $0x40] sm:$0xff]  ;;  %v76_v22 = vld [vmem:[#allocation3 + $0x50] sm:$0xff]  ;;  %v79_v24 = vld [vmem:[#allocation3 + $0x68] sm:$0xff]  ;;  %vm275_vm11 = vcmask 523648   ;;  %vm277_vm12 = vcmask 520576   ;;  %s655_s17 = smov 48  }
  0x19   :  { %562 = vmatpush1.bf16.msra.mxu0 %v561_v12  ;;  %575 = vmatpush1.bf16.msra.mxu1 %v561_v12  ;;  %v569_v23 = vpack.c.bf16 %v76_v22, %v74_v21  ;;  %v78_v25 = vld [vmem:[#allocation3 + $0x60] sm:$0xff]  ;;  %vm388_vm13 = vcmask 1048448   ;;  %vm390_vm14 = vcmask 1044352   ;;  %vm410_vm15 = vcmask 1041409  }
  0x1a   :  { %52 = vperm.xlu1 %592, %v39_v4   ;;  %46 = vperm.xlu0 %591, %v37_v5  }
  0x1b   :  { %564 = vmatprep.subr.bf16.mxu0 %v563_v16  ;;  %572 = vmatprep.subr.bf16.mxu1 %v563_v16 }
  0x1d   :  { %566 = vmatpush1.bf16.msra.mxu0 %v565_v19  ;;  %576 = vmatpush1.bf16.msra.mxu1 %v565_v19 }
  0x1e   :  { %568 = vmatprep.subr.bf16.mxu0 %v567_v20  ;;  %573 = vmatprep.subr.bf16.mxu1 %v567_v20 }
  0x21   :  { %570 = vmatpush1.bf16.msra.mxu0 %v569_v23  ;;  %577 = vmatpush1.bf16.msra.mxu1 %v569_v23 }
  0x22   :  { %105 = vmatprep.subr.mxu0 %v79_v24  ;;  %574 = vmatprep.subr.mxu1 %v79_v24 }
  0x25   :  { %106 = vmatpush1.msra.mxu0 %v78_v25  ;;  %578 = vmatpush1.msra.mxu1 %v78_v25 }
  0x26   :  { %554 = vmatprep.subr.mxu1 %v649_v1 }
  0x95   :  { %v50_v28 = vpop.permute.xlu1 %49  ;;  %v44_v29 = vpop.permute.xlu0 %43 }
  0x96   :  { %vm54_vm1 = vcmp.eq.s32.totalorder %v41_v27, %v44_v29  ;;  %vm56_vm4 = vcmp.eq.s32.totalorder %v41_v27, %v50_v28 }
  0x97   :  { %v540_v30 = vsel %vm54_vm1, 1.0, %v649_v1  ;;  %v542_v35 = vsel %vm56_vm4, 1.0, %v649_v1  ;;  %vm426_vm1 = vcmask 261120  }
  0x98   :  { %544 = vmatmul.mubr.msk.f32.vlgmr.msra.gmra.mrb[0].mxu0 %vm80_vm0, %v540_v30 }
  0x99   :  { %v53_v31 = vpop.permute.xlu1 %52  ;;  %v47_v32 = vpop.permute.xlu0 %46  ;;  %163 = vmatprep.mubr.f32.mxu0 %v649_v1 }
  0x9a   :  { %vm57_vm2 = vcmp.eq.s32.totalorder %v41_v27, %v53_v31  ;;  %vm55_vm3 = vcmp.eq.s32.totalorder %v41_v27, %v47_v32 }
  0x9b   :  { %v543_v33 = vsel %vm57_vm2, 1.0, %v649_v1  ;;  %v541_v34 = vsel %vm55_vm3, 1.0, %v649_v1  ;;  %vm440_vm2 = vcmask 392192   ;;  %vm523_vm3 = vcmask 8192  }
  0x9c   :  { %545 = vmatmul.mubr.msk.f32.gmra.mrb[2].mxu0 %vm80_vm0, %v541_v34  ;;  %547 = vmatmul.mubr.msk.f32.vlgmr.msra.gmra.mrb[0].mxu1 %vm80_vm0, %v543_v33 }
  0x9d   :  { %169 = vmatprep.mubr.f32.mxu0 %v649_v1 }
  0xa0   :  { %546 = vmatmul.mubr.msk.f32.gmra.mrb[4].mxu0 %vm80_vm0, %v542_v35  ;;  %vm654_vm0 = vmmov 0  }
  0xa1   :  { %556 = vmatprep.mubr.msk.f32.mxu1 %vm654_vm0, %v649_v1 }
 0x16b   :  { %v724_v36 = vpop.f32.mrb[0].mxu0 }
 0x16c   :  { %v161_v37 = vpop.f32.mrb[1].mxu0  ;;  %v187_v38 = vrot.slane %v724_v36, 1  ;;  %v210_v39 = vrot.slane %v724_v36, 2  ;;  %v253_v40 = vrot.slane %v724_v36, 3 }
 0x16d   :  { %v299_v41 = vrot.slane %v161_v37, 1  ;;  %v321_v42 = vrot.slane %v161_v37, 2  ;;  %v343_v43 = vrot.slane %v161_v37, 3  ;;  %v366_v44 = vrot.slane %v161_v37, 4 }
 0x16f   :  { %v729_v45 = vpop.f32.mrb[2].mxu0  ;;  %v731_v46 = vpop.f32.mrb[0].mxu1 }
 0x170   :  { %v733_v47 = vpop.f32.mrb[3].mxu0  ;;  %v735_v48 = vpop.f32.mrb[1].mxu1  ;;  %v191_v49 = vrot.slane %v731_v46, 1  ;;  %v188_v50 = vrot.slane %v729_v45, 1  ;;  %v214_v51 = vrot.slane %v731_v46, 2  ;;  %v211_v52 = vrot.slane %v729_v45, 2 }
 0x171   :  { %v300_v53 = vrot.slane %v733_v47, 1  ;;  %v322_v54 = vrot.slane %v733_v47, 2  ;;  %v344_v55 = vrot.slane %v733_v47, 3  ;;  %v367_v56 = vrot.slane %v733_v47, 4 }
 0x172   :  { %199 = vrot.lane.b32.xlu1 %v191_v49, %s650_s0  ;;  %v189_v57 = vsel %vm186_vm5, %v187_v38, %v188_v50  ;;  %v212_v58 = vsel %vm209_vm6, %v210_v39, %v211_v52  ;;  %v257_v59 = vrot.slane %v731_v46, 3  ;;  %v254_v60 = vrot.slane %v729_v45, 3 }
 0x173   :  { %193 = vrot.lane.b32.xlu0 %v189_v57, %s650_s0  ;;  %v751_v61 = vpop.f32.mrb[4].mxu0  ;;  %v303_v62 = vrot.slane %v735_v48, 1  ;;  %v301_v63 = vsel %vm186_vm5, %v299_v41, %v300_v53  ;;  %v325_v0 = vrot.slane %v735_v48, 2  ;;  %v323_v2 = vsel %vm209_vm6, %v321_v42, %v322_v54 }
 0x174   :  { %v173_v3 = vpop.f32.mrb[5].mxu0  ;;  %v255_v4 = vsel %vm252_vm7, %v253_v40, %v254_v60  ;;  %v347_v5 = vrot.slane %v735_v48, 3  ;;  %v345_v6 = vsel %vm252_vm7, %v343_v43, %v344_v55  ;;  %v368_v7 = vsel %vm365_vm8, %v366_v44, %v367_v56 }
 0x175   :  { %v302_v8 = vrot.slane %v173_v3, 1  ;;  %v324_v9 = vrot.slane %v173_v3, 2  ;;  %v346_v10 = vrot.slane %v173_v3, 3  ;;  %v369_v11 = vrot.slane %v173_v3, 4 }
 0x176   :  { %222 = vrot.lane.b32.xlu1 %v214_v51, %s651_s14  ;;  %v190_v12 = vrot.slane %v751_v61, 1  ;;  %v213_v13 = vrot.slane %v751_v61, 2  ;;  %v256_v14 = vrot.slane %v751_v61, 3  ;;  %v370_v15 = vrot.slane %v735_v48, 4 }
 0x177   :  { %216 = vrot.lane.b32.xlu0 %v212_v58, %s651_s14  ;;  %v304_v16 = vsel %vm186_vm5, %v302_v8, %v303_v62  ;;  %v326_v17 = vsel %vm209_vm6, %v324_v9, %v325_v0  ;;  %v348_v18 = vsel %vm252_vm7, %v346_v10, %v347_v5 }
 0x178   :  { %v192_v19 = vsel %vm186_vm5, %v190_v12, %v191_v49  ;;  %v215_v20 = vsel %vm209_vm6, %v213_v13, %v214_v51  ;;  %v258_v21 = vsel %vm252_vm7, %v256_v14, %v257_v59  ;;  %v371_v22 = vsel %vm365_vm8, %v369_v11, %v370_v15 }
 0x17a   :  { %265 = vrot.lane.b32.xlu1 %v257_v59, %s652_s15 }
 0x17b   :  { %259 = vrot.lane.b32.xlu0 %v255_v4, %s652_s15 }
 0x17e   :  { %311 = vrot.lane.b32.xlu1 %v303_v62, %s650_s0 }
 0x17f   :  { %305 = vrot.lane.b32.xlu0 %v301_v63, %s650_s0 }
 0x182   :  { %333 = vrot.lane.b32.xlu1 %v325_v0, %s651_s14 }
 0x183   :  { %327 = vrot.lane.b32.xlu0 %v323_v2, %s651_s14 }
 0x186   :  { %355 = vrot.lane.b32.xlu1 %v347_v5, %s652_s15 }
 0x187   :  { %349 = vrot.lane.b32.xlu0 %v345_v6, %s652_s15 }
 0x18a   :  { %195 = vrot.lane.b32.xlu1 %v188_v50, %s650_s0 }
 0x18b   :  { %372 = vrot.lane.b32.xlu0 %v368_v7, %s653_s16 }
 0x18e   :  { %218 = vrot.lane.b32.xlu1 %v211_v52, %s651_s14 }
 0x18f   :  { %197 = vrot.lane.b32.xlu0 %v192_v19, %s650_s0 }
 0x192   :  { %261 = vrot.lane.b32.xlu1 %v254_v60, %s652_s15 }
 0x193   :  { %220 = vrot.lane.b32.xlu0 %v215_v20, %s651_s14 }
 0x196   :  { %307 = vrot.lane.b32.xlu1 %v300_v53, %s650_s0 }
 0x197   :  { %263 = vrot.lane.b32.xlu0 %v258_v21, %s652_s15 }
 0x19a   :  { %329 = vrot.lane.b32.xlu1 %v322_v54, %s651_s14 }
 0x19b   :  { %309 = vrot.lane.b32.xlu0 %v304_v16, %s650_s0 }
 0x19e   :  { %351 = vrot.lane.b32.xlu1 %v344_v55, %s652_s15 }
 0x19f   :  { %331 = vrot.lane.b32.xlu0 %v326_v17, %s651_s14 }
 0x1a2   :  { %374 = vrot.lane.b32.xlu1 %v367_v56, %s653_s16 }
 0x1a3   :  { %353 = vrot.lane.b32.xlu0 %v348_v18, %s652_s15 }
 0x1a6   :  { %378 = vrot.lane.b32.xlu1 %v370_v15, %s653_s16 }
 0x1a7   :  { %376 = vrot.lane.b32.xlu0 %v371_v22, %s653_s16 }
 0x1e4   :  { %v200_v23 = vpop.permute.xlu1 %199 }
 0x1e5   :  { %v194_v24 = vpop.permute.xlu0 %193  ;;  %v208_v44 = vadd.f32 %v200_v23, %v731_v46 }
 0x1e6   :  { %v205_v37 = vadd.f32 %v194_v24, %v724_v36 }
 0x1e8   :  { %v223_v25 = vpop.permute.xlu1 %222 }
 0x1e9   :  { %v217_v26 = vpop.permute.xlu0 %216  ;;  %v231_v50 = vadd.f32 %v223_v25, %v208_v44 }
 0x1ea   :  { %v228_v39 = vadd.f32 %v217_v26, %v205_v37 }
 0x1eb   :  { %v244_v62 = vsel %vm234_vm10, %v231_v50, -inf }
 0x1ec   :  { %v266_v27 = vpop.permute.xlu1 %265  ;;  %v233_v47 = vsel %vm232_vm9, %v228_v39, -inf }
 0x1ed   :  { %v260_v28 = vpop.permute.xlu0 %259  ;;  %v274_v58 = vadd.f32 %v266_v27, %v231_v50 }
 0x1ee   :  { %v271_v48 = vadd.f32 %v260_v28, %v228_v39 }
 0x1ef   :  { %v287_v9 = vsel %vm277_vm12, %v274_v58, -inf }
 0x1f0   :  { %v786_v29 = vpop.permute.xlu1 %311  ;;  %v276_v59 = vsel %vm275_vm11, %v271_v48, -inf }
 0x1f1   :  { %v306_v30 = vpop.permute.xlu0 %305  ;;  %v320_v37 = vadd.f32 %v786_v29, %v731_v46 }
 0x1f2   :  { %v317_v11 = vadd.f32 %v306_v30, %v724_v36 }
 0x1f4   :  { %v788_v31 = vpop.permute.xlu1 %333 }
 0x1f5   :  { %v328_v32 = vpop.permute.xlu0 %327 }
 0x1f6   :  { %v339_v19 = vadd.f32 %v328_v32, %v317_v11 }
 0x1f8   :  { %v790_v33 = vpop.permute.xlu1 %355 }
 0x1f9   :  { %v350_v34 = vpop.permute.xlu0 %349 }
 0x1fa   :  { %v361_v24 = vadd.f32 %v350_v34, %v339_v19 }
 0x1fc   :  { %v196_v35 = vpop.permute.xlu1 %195 }
 0x1fd   :  { %v373_v38 = vpop.permute.xlu0 %372  ;;  %v206_v40 = vadd.f32 %v196_v35, %v729_v45 }
 0x1fe   :  { %v384_v39 = vadd.f32 %v373_v38, %v361_v24 }
 0x200   :  { %v219_v41 = vpop.permute.xlu1 %218  ;;  %v389_v38 = vsel %vm388_vm13, %v384_v39, -inf }
 0x201   :  { %v229_v42 = vadd.f32 %v219_v41, %v206_v40  ;;  %v198_v43 = vpop.permute.xlu0 %197 }
 0x202   :  { %v207_v52 = vadd.f32 %v198_v43, %v751_v61 }
 0x203   :  { %v235_v49 = vsel %vm234_vm10, %v229_v42, -inf }
 0x204   :  { %v236_v51 = vmax.f32 %v233_v47, %v235_v49  ;;  %v262_v53 = vpop.permute.xlu1 %261 }
 0x205   :  { %v272_v54 = vadd.f32 %v262_v53, %v229_v42  ;;  %v221_v55 = vpop.permute.xlu0 %220 }
 0x206   :  { %v237_v56 = vrot.slane %v236_v51, 4  ;;  %v230_v57 = vadd.f32 %v221_v55, %v207_v52 }
 0x207   :  { %v278_v60 = vsel %vm277_vm12, %v272_v54, -inf }
 0x208   :  { %v238_v63 = vmax.f32 %v236_v51, %v237_v56  ;;  %v279_v0 = vmax.f32 %v276_v59, %v278_v60  ;;  %v243_v2 = vsel %vm232_vm9, %v230_v57, -inf  ;;  %v308_v3 = vpop.permute.xlu1 %307 }
 0x209   :  { %v245_v4 = vmax.f32 %v243_v2, %v244_v62  ;;  %v264_v5 = vpop.permute.xlu0 %263  ;;  %v318_v22 = vadd.f32 %v308_v3, %v729_v45  ;;  %v342_v45 = vadd.f32 %v788_v31, %v320_v37 }
 0x20a   :  { %v239_v6 = vrot.slane %v238_v63, 2  ;;  %v280_v7 = vrot.slane %v279_v0, 4  ;;  %v273_v8 = vadd.f32 %v264_v5, %v230_v57 }
 0x20b   :  { %v246_v10 = vrot.slane %v245_v4, 4  ;;  %v364_v46 = vadd.f32 %v790_v33, %v342_v45 }
 0x20c   :  { %v240_v12 = vmax.f32 %v238_v63, %v239_v6  ;;  %v281_v13 = vmax.f32 %v279_v0, %v280_v7  ;;  %v286_v14 = vsel %vm275_vm11, %v273_v8, -inf  ;;  %v330_v15 = vpop.permute.xlu1 %329 }
 0x20d   :  { %v247_v16 = vmax.f32 %v245_v4, %v246_v10  ;;  %v288_v17 = vmax.f32 %v286_v14, %v287_v9  ;;  %v310_v18 = vpop.permute.xlu0 %309  ;;  %v340_v30 = vadd.f32 %v330_v15, %v318_v22  ;;  %v548_v15 = vld [vmem:[%s844_s2] ss:$0 sm:$0xff]  ;;  %s656_s2 = smov [#allocation6]  }
 0x20e   :  { %v282_v20 = vrot.slane %v281_v13, 2  ;;  %v241_v25 = vrot.slane %v240_v12, 1  ;;  %v319_v34 = vadd.f32 %v310_v18, %v751_v61  ;;  %s531_s24 = sshll.u32 %s656_s2, 4  ;;  %s532_s24 = int_to_ptr.vmem [resolvable:$true] %s531_s24 }
 0x20f   :  { %v248_v21 = vrot.slane %v247_v16, 2  ;;  %v289_v23 = vrot.slane %v288_v17, 4  ;;  %s623_s25 = scalar_lea.vmem %s532_s24, 32  ;;  %p624_p9 = scmp.lt.s32.totalorder %s532_s24, %s532_s24 }
 0x210   :  { %v352_v26 = vpop.permute.xlu1 %351  ;;  %v283_v27 = vmax.f32 %v281_v13, %v282_v20  ;;  %v242_v43 = vmax.f32 %v240_v12, %v241_v25  ;;  %v437_v20 = vld [vmem:[%s845_s3] sm:$0x1]  ;;  %s619_s3 = scalar_lea.vmem %s532_s24, 16 }
 0x211   :  { %v249_v28 = vmax.f32 %v247_v16, %v248_v21  ;;  %v290_v36 = vmax.f32 %v288_v17, %v289_v23  ;;  %v332_v35 = vpop.permute.xlu0 %331  ;;  %v362_v41 = vadd.f32 %v352_v26, %v340_v30  ;;  %v439_v21 = vstv %s846_s4  ;;  %p620_p8 = scmp.ne.s32.totalorder %s532_s24, %s619_s3  ;;  %p625_p10 = scmp.lt.s32.totalorder %s623_s25, %s619_s3 }
 0x212   :  { %v284_v49 = vrot.slane %v283_v27, 1  ;;  %v341_v29 = vadd.f32 %v332_v35, %v319_v34 }
 0x213   :  { %v250_v32 = vrot.slane %v249_v28, 1  ;;  %v291_v40 = vrot.slane %v290_v36, 2  ;;  %p626_p11 = por %p625_p10, %p624_p9 }
 0x214   :  { %v375_v42 = vpop.permute.xlu1 %374  ;;  %v285_v57 = vmax.f32 %v283_v27, %v284_v49 }
 0x215   :  { %v292_v44 = vmax.f32 %v290_v36, %v291_v40  ;;  %v385_v47 = vadd.f32 %v375_v42, %v362_v41  ;;  %v354_v48 = vpop.permute.xlu0 %353  ;;  %v251_v50 = vmax.f32 %v249_v28, %v250_v32  ;;  %p627_p12 = pnand %p626_p11, %p620_p8 }
 0x216   :  { %v363_v61 = vadd.f32 %v354_v48, %v341_v29 }
 0x217   :  { %v391_v51 = vsel %vm390_vm14, %v385_v47, -inf  ;;  %v293_v52 = vrot.slane %v292_v44, 1  ;;  %v411_v31 = vsel %vm410_vm15, %v251_v50, %v242_v43 }
 0x218   :  { %v392_v53 = vmax.f32 %v389_v38, %v391_v51  ;;  %v379_v54 = vpop.permute.xlu1 %378 }
 0x219   :  { %v387_v55 = vadd.f32 %v379_v54, %v364_v46  ;;  %v377_v56 = vpop.permute.xlu0 %376  ;;  %v294_v58 = vmax.f32 %v292_v44, %v293_v52 }
 0x21a   :  { %v393_v59 = vrot.slane %v392_v53, 4  ;;  %v386_v60 = vadd.f32 %v377_v56, %v363_v61 }
 0x21b   :  { %v400_v62 = vsel %vm390_vm14, %v387_v55, -inf  ;;  %v415_v33 = vsel %vm410_vm15, %v294_v58, %v285_v57 }
 0x21c   :  { %v394_v63 = vmax.f32 %v392_v53, %v393_v59  ;;  %v399_v0 = vsel %vm388_vm13, %v386_v60, -inf  ;;  %416 = vrot.lane.b32.xlu0 %v415_v33, %s651_s14 }
 0x21d   :  { %v401_v2 = vmax.f32 %v399_v0, %v400_v62 }
 0x21e   :  { %v395_v3 = vrot.slane %v394_v63, 2 }
 0x21f   :  { %v402_v4 = vrot.slane %v401_v2, 4 }
 0x220   :  { %v396_v5 = vmax.f32 %v394_v63, %v395_v3 }
 0x221   :  { %v403_v6 = vmax.f32 %v401_v2, %v402_v4 }
 0x222   :  { %v397_v9 = vrot.slane %v396_v5, 1 }
 0x223   :  { %v404_v7 = vrot.slane %v403_v6, 2 }
 0x224   :  { %v398_v11 = vmax.f32 %v396_v5, %v397_v9 }
 0x225   :  { %v405_v8 = vmax.f32 %v403_v6, %v404_v7 }
 0x227   :  { %v406_v10 = vrot.slane %v405_v8, 1 }
 0x229   :  { %v407_v12 = vmax.f32 %v405_v8, %v406_v10 }
 0x22b   :  { %v421_v13 = vsel %vm410_vm15, %v407_v12, %v398_v11 }
 0x22c   :  { %422 = vrot.lane.b32.xlu1 %v421_v13, %s655_s17 }
 0x28e   :  { %v417_v14 = vpop.permute.xlu0 %416 }
 0x28f   :  { %v425_v16 = vsel %vm232_vm9, %v411_v31, %v417_v14 }
 0x29e   :  { %v423_v17 = vpop.permute.xlu1 %422 }
 0x29f   :  { %v427_v18 = vsel %vm426_vm1, %v425_v16, %v423_v17 }
 0x2a0   :  { %v435_v19 = vadd.f32 %v548_v15, %v427_v18 }
 0x2a2   :  { %v436_v1 = vmax.f32 %v435_v19, 0.0 }
 0x2a4   :  { %555 = vmatpush3.xpose.msk.msra.mxu1 %vm440_vm2, %v436_v1 }
 0x2a7   :  { %557 = vmatmul.mubr.msk.f32.vlgmr.msra.gmra.mrb[2].mxu1 %vm440_vm2, %v437_v20 }
 0x37a   :  { %v513_v22 = vpop.f32.mrb[2].mxu1 }
 0x37b   :  { %v514_v23 = vadd.f32 %v513_v22, %v439_v21  ;;  %v558_v24 = vpop.f32.mrb[3].mxu1 }
 0x37d   :  { %v551_v25 = vmul.f32 -1.442695, %v514_v23 }
 0x37f   :  { %593 = vpow2.f32 %v551_v25 }
 0x389   :  { %v594_v26 = vpop.eup %593 }
 0x38a   :  { %v520_v27 = vadd.f32 1.0, %v594_v26 }
 0x38c   :  { %595 = vrcp.f32 %v520_v27 }
 0x396   :  { %v596_v28 = vpop.eup %595 }
 0x397   :  { %524 = vst.msk [vmem:[#allocation6] sm:$0x1] %vm523_vm3, %v596_v28 }
 0x398   :  { %630 = shalt.err (!%p627_p12)
}
 0x399   :  { %s631_s27 = scalar_lea.hbm %s847_s5, 16 }
 0x39a   :  { %p632_p13 = scmp.ne.s32.totalorder %s847_s5, %s631_s27  ;;  %p635_p0 = scmp.lt.u32.totalorder %s631_s27, %s847_s5 }
 0x39c   :  { %p637_p1 = pnand %p635_p0, %p632_p13 }
 0x39e   :  { %640 = shalt.err (!%p637_p1)
}
 0x39f   :  { %534 = dma.vmem_to_hbm [thread:$0]  %s532_s24, 16, %s847_s5, [#allocation5]  }
 0x3a0   :  { %643 = dma.done.wait [#allocation5], 16  }
 0x3a1   :  { %644 = vsyncadd [#allocation5], 4294967280 }
 0x3a2   :  { %538 = vsyncpa [#allocation4], 1 }
 0x3a3   :  { %539 = vsyncpa [#allocation5], 1 }

</bundles_post_ra>
